<compile_context>
chip_gen: v7x
topology: tpu7x:2x2x1
jax: 0.10.0
libtpu: 0.0.40
codegen_flags: <defaults>
</compile_context>

<pallas_src>
import jax
import jax.numpy as jnp
from jax.experimental import pallas as pl
from jax.experimental.pallas import tpu as pltpu


def _round_up(x, m):
    return ((x + m - 1) // m) * m


def _choose_tm(B, block_b):
    """Batch tile: >=2 grid steps when B >= 16 (v7x megacore), MXU-friendly."""
    half = _round_up(max(pl.cdiv(B, 2), 8), 8)
    tm = min(block_b, half)
    if tm >= 256:
        tm = (tm // 256) * 256     # fill the 256-wide MXU rows on v6e/v7x
    elif tm >= 128:
        tm = (tm // 128) * 128     # v5e MXU is 128-wide
    return tm


def classifier_head_kernel(h_ref, w1_ref, b1_ref, w2_ref, b2_ref, o_ref):
    """Fused classifier head: CLS read -> Linear(H,H) -> Mish -> Linear(H,Cp).

    h_ref : (TM, H)  f32    CLS-token rows (block column 0 of the (B, S*H) view)
    w1_ref: (H, H)   bf16   first Linear weight, (in, out) layout
    b1_ref: (1, H)   f32    first Linear bias
    w2_ref: (H, Cp)  bf16   second Linear weight, (in, out), classes zero-padded
    b2_ref: (1, Cp)  f32    second Linear bias (zero-padded)
    o_ref : (TM, Cp) f32    lane-dense logits; caller slices [:, :C]
    """
    # Fused CLS read + cast to bf16 MXU operand.
    h = h_ref[...].astype(jnp.bfloat16)

    # y1 = h @ W1 + b1   (bf16 operands, f32 accumulation on the MXU)
    y1 = jnp.dot(h, w1_ref[...], preferred_element_type=jnp.float32) + b1_ref[...]

    # mish(x) = x * tanh(softplus(x)) with a single transcendental:
    #   tanh(log(1 + e^x)) = e*(e+2) / (e*(e+2) + 2),   e = exp(x)
    # The e*(e+2) form avoids cancellation for very negative x; clamping the exp
    # argument at 20 keeps f32 finite (the ratio is already 1 to ~1e-17 there).
    e = jnp.exp(jnp.minimum(y1, 20.0))
    num = e * (e + 2.0)
    z = y1 * (num * pl.reciprocal(num + 2.0, approx=True))

    # y2 = z @ W2 + b2
    y2 = jnp.dot(z.astype(jnp.bfloat16), w2_ref[...],
                 preferred_element_type=jnp.float32) + b2_ref[...]
    o_ref[...] = y2.astype(o_ref.dtype)


def prepare_classifier_params(w1t, b1, w2t, b2):
    """One-time (per-model) parameter prep: bf16 cast + lane-dense class padding.

    Hoisted out of the per-call path so the kernel's resident-weight DMA is the
    only weight traffic at inference time.  Weights are (in, out) layout.
    """
    H, C = w2t.shape
    Cp = _round_up(C, 128)
    return {
        "w1": w1t.astype(jnp.bfloat16),                                   # (H, H)
        "b1": b1.reshape(1, H).astype(jnp.float32),                       # (1, H)
        "w2": jnp.pad(w2t, ((0, 0), (0, Cp - C))).astype(jnp.bfloat16),   # (H, Cp)
        "b2": jnp.pad(b2, (0, Cp - C)).reshape(1, Cp).astype(jnp.float32),
        "n_classes": C,
    }


def classification_head(hidden_states, params, *, block_b=512):
    """ClassificationModel.forward on top of the base model's hidden states.

    hidden_states: (B, S, H) float32 — base_model output (token hidden states).
    params: output of prepare_classifier_params().  Returns logits (B, C) f32.
    """
    B, S, H = hidden_states.shape
    w1, b1, w2, b2 = params["w1"], params["b1"], params["w2"], params["b2"]
    C = params["n_classes"]
    Cp = w2.shape[1]
    assert H % 128 == 0, "hidden size must be lane-aligned for the fused CLS read"

    # CLS slice fused into the kernel: (B, S, H) -> (B, S*H) is metadata-only
    # for a contiguous array; block column 0 of width H is exactly token 0.
    flat = hidden_states.reshape(B, S * H)

    TM = _choose_tm(B, block_b)
    grid = (pl.cdiv(B, TM),)   # ragged last tile handled by Pallas (masked writes)

    flops = 2 * B * H * H + 2 * B * H * Cp + 10 * B * H
    transcendentals = 2 * B * H                       # exp + approx reciprocal
    bytes_accessed = (B * H * 4 + H * H * 2 + H * Cp * 2
                      + (H + Cp) * 4 + B * Cp * 4)

    # Pallas double-buffers *every* BlockSpec input (even constant index_maps),
    # so count activations, output and resident weights at 2x, plus headroom.
    # TODO(synk): for very large H (W1 bf16 >= ~8 MiB) add a K-axis grid with an
    #             f32 accumulator scratch instead of keeping W1 resident.
    vmem_bytes = (2 * (TM * H * 4 + TM * Cp * 4
                       + H * H * 2 + H * Cp * 2 + (H + Cp) * 4)
                  + (2 << 20))
    try:
        phys_vmem = pltpu.get_tpu_info().vmem_capacity_bytes
    except Exception:
        phys_vmem = 64 << 20   # conservative (v7x per-TensorCore)
    vmem_limit = min(max(vmem_bytes, 4 << 20), (phys_vmem * 3) // 4)

    out = pl.pallas_call(
        classifier_head_kernel,
        out_shape=jax.ShapeDtypeStruct((B, Cp), jnp.float32),
        grid=grid,
        in_specs=[
            pl.BlockSpec((TM, H), lambda i: (i, 0)),    # CLS rows, streamed f32
            pl.BlockSpec((H, H), lambda i: (0, 0)),     # W1 resident
            pl.BlockSpec((1, H), lambda i: (0, 0)),     # b1 resident
            pl.BlockSpec((H, Cp), lambda i: (0, 0)),    # W2 resident
            pl.BlockSpec((1, Cp), lambda i: (0, 0)),    # b2 resident
        ],
        out_specs=pl.BlockSpec((TM, Cp), lambda i: (i, 0)),
        compiler_params=pltpu.CompilerParams(
            dimension_semantics=("parallel",),
            vmem_limit_bytes=vmem_limit,
        ),
        cost_estimate=pl.CostEstimate(
            flops=flops, transcendentals=transcendentals,
            bytes_accessed=bytes_accessed),
    )(flat, w1, b1, w2, b2)
    # TODO(synk): the lane-padded (B, Cp) block could be consumed directly by a
    # downstream op (masked softmax/argmax) to skip this slice copy.
    return out[:, :C]


def reference_head(hidden_states, w1t, b1, w2t, b2):
    """Plain-JAX f32 reference matching the PyTorch classifier (eval mode)."""
    cls = hidden_states[:, 0, :]
    y1 = cls @ w1t + b1
    sp = jnp.maximum(y1, 0.0) + jnp.log1p(jnp.exp(-jnp.abs(y1)))
    z = y1 * jnp.tanh(sp)
    return z @ w2t + b2


if __name__ == "__main__":
    # Small shapes consistent with the module's forward.
    B, S, H, C = 8, 16, 128, 8  # batch, seq, base_model_output_size, n_classes

    key = jax.random.PRNGKey(0)
    k_hid, k_w1, k_w2 = jax.random.split(key, 3)

    # Stand-in for base_model(X, attention_mask)[0]  ->  (B, S, H)
    hidden_states = jax.random.normal(k_hid, (B, S, H), dtype=jnp.float32)

    # Parameter init mirrors the PyTorch module: weight ~ N(0, 0.02), bias = 0.
    # PyTorch Linear weight is (out, in); store transposed (in, out) here.
    w1t = 0.02 * jax.random.normal(k_w1, (H, H), dtype=jnp.float32)
    b1 = jnp.zeros((H,), dtype=jnp.float32)
    w2t = 0.02 * jax.random.normal(k_w2, (H, C), dtype=jnp.float32)
    b2 = jnp.zeros((C,), dtype=jnp.float32)

    # One-time parameter prep (bf16 cast + class padding), outside the hot path.
    params = prepare_classifier_params(w1t, b1, w2t, b2)

    logits = classification_head(hidden_states, params)
    logits = jax.block_until_ready(logits)

    ref = reference_head(hidden_states, w1t, b1, w2t, b2)
    assert logits.shape == (B, C)
    max_err = float(jnp.max(jnp.abs(logits - ref)))
    # bf16 matmul operands + approx reciprocal => loose-but-safe tolerance.
    assert jnp.allclose(logits, ref, atol=5e-3, rtol=5e-2), max_err

    print("KERNEL_OK")
</pallas_src>

<mosaic_0001>
module attributes {stable_mosaic.version = 11 : i64} {
  func.func @classifier_head_kernel(%arg0: i32, %arg1: memref<8x128xf32, #tpu.memory_space<vmem>>, %arg2: memref<128x128xbf16, #tpu.memory_space<vmem>>, %arg3: memref<1x128xf32, #tpu.memory_space<vmem>>, %arg4: memref<128x128xbf16, #tpu.memory_space<vmem>>, %arg5: memref<1x128xf32, #tpu.memory_space<vmem>>, %arg6: memref<8x128xf32, #tpu.memory_space<vmem>>) attributes {dimension_semantics = [#tpu.dimension_semantics<parallel>], iteration_bounds = array<i64: 1>, scalar_prefetch = 0 : i64, scratch_operands = 0 : i64, tpu.core_type = #tpu.core_type<tc>, window_params = [{transform_indices = @transform_0, window_bounds = array<i64: 8, 128>}, {pipeline_mode = #tpu.pipeline_mode<synchronous>, transform_indices = @transform_1, window_bounds = array<i64: 128, 128>}, {pipeline_mode = #tpu.pipeline_mode<synchronous>, transform_indices = @transform_2, window_bounds = array<i64: 1, 128>}, {pipeline_mode = #tpu.pipeline_mode<synchronous>, transform_indices = @transform_3, window_bounds = array<i64: 128, 128>}, {pipeline_mode = #tpu.pipeline_mode<synchronous>, transform_indices = @transform_4, window_bounds = array<i64: 1, 128>}, {transform_indices = @transform_5, window_bounds = array<i64: 8, 128>}]} {
    %c0 = arith.constant 0 : index
    %c0_0 = arith.constant 0 : index
    %0 = vector.load %arg1[%c0, %c0_0] : memref<8x128xf32, #tpu.memory_space<vmem>>, vector<8x128xf32>
    %1 = arith.truncf %0 : vector<8x128xf32> to vector<8x128xbf16>
    %c0_1 = arith.constant 0 : index
    %c0_2 = arith.constant 0 : index
    %2 = vector.load %arg2[%c0_1, %c0_2] : memref<128x128xbf16, #tpu.memory_space<vmem>>, vector<128x128xbf16>
    %cst = arith.constant dense<0.000000e+00> : vector<8x128xf32>
    %3 = tpu.matmul %1, %2, %cst {dimension_numbers = #tpu.dot_dimension_numbers<[1], [0], [0], [1], [0, 0, 1, 1], [], []>} : vector<8x128xbf16>, vector<128x128xbf16>, vector<8x128xf32> -> vector<8x128xf32>
    %c0_3 = arith.constant 0 : index
    %c0_4 = arith.constant 0 : index
    %4 = vector.load %arg3[%c0_3, %c0_4] : memref<1x128xf32, #tpu.memory_space<vmem>>, vector<1x128xf32>
    %5 = vector.broadcast %4 : vector<1x128xf32> to vector<8x128xf32>
    %6 = arith.addf %3, %5 : vector<8x128xf32>
    %cst_5 = arith.constant 2.000000e+01 : f32
    %7 = vector.broadcast %cst_5 : f32 to vector<8x128xf32>
    %8 = arith.minimumf %6, %7 : vector<8x128xf32>
    %9 = math.exp %8 : vector<8x128xf32>
    %cst_6 = arith.constant 2.000000e+00 : f32
    %10 = vector.broadcast %cst_6 : f32 to vector<8x128xf32>
    %11 = arith.addf %9, %10 : vector<8x128xf32>
    %12 = arith.mulf %9, %11 : vector<8x128xf32>
    %cst_7 = arith.constant 2.000000e+00 : f32
    %13 = vector.broadcast %cst_7 : f32 to vector<8x128xf32>
    %14 = arith.addf %12, %13 : vector<8x128xf32>
    %15 = tpu.reciprocal %14 {approx = true} : vector<8x128xf32> -> vector<8x128xf32>
    %16 = arith.mulf %12, %15 : vector<8x128xf32>
    %17 = arith.mulf %6, %16 : vector<8x128xf32>
    %18 = arith.truncf %17 : vector<8x128xf32> to vector<8x128xbf16>
    %c0_8 = arith.constant 0 : index
    %c0_9 = arith.constant 0 : index
    %19 = vector.load %arg4[%c0_8, %c0_9] : memref<128x128xbf16, #tpu.memory_space<vmem>>, vector<128x128xbf16>
    %cst_10 = arith.constant dense<0.000000e+00> : vector<8x128xf32>
    %20 = tpu.matmul %18, %19, %cst_10 {dimension_numbers = #tpu.dot_dimension_numbers<[1], [0], [0], [1], [0, 0, 1, 1], [], []>} : vector<8x128xbf16>, vector<128x128xbf16>, vector<8x128xf32> -> vector<8x128xf32>
    %c0_11 = arith.constant 0 : index
    %c0_12 = arith.constant 0 : index
    %21 = vector.load %arg5[%c0_11, %c0_12] : memref<1x128xf32, #tpu.memory_space<vmem>>, vector<1x128xf32>
    %22 = vector.broadcast %21 : vector<1x128xf32> to vector<8x128xf32>
    %23 = arith.addf %20, %22 : vector<8x128xf32>
    %c0_13 = arith.constant 0 : index
    %c0_14 = arith.constant 0 : index
    %24 = vector.load %arg6[%c0_13, %c0_14] : memref<8x128xf32, #tpu.memory_space<vmem>>, vector<8x128xf32>
    tpu.vector_store %arg6[%c0_13, %c0_14], %23 {strides = array<i32>} : memref<8x128xf32, #tpu.memory_space<vmem>>, vector<8x128xf32>,
    return
  }
  func.func @transform_0(%arg0: i32) -> (i32, i32) {
    %c0_i32 = arith.constant 0 : i32
    %c0_i32_0 = arith.constant 0 : i32
    return %arg0, %c0_i32 : i32, i32
  }
  func.func @transform_1(%arg0: i32) -> (i32, i32) {
    %c0_i32 = arith.constant 0 : i32
    %c0_i32_0 = arith.constant 0 : i32
    %c0_i32_1 = arith.constant 0 : i32
    return %c0_i32, %c0_i32_0 : i32, i32
  }
  func.func @transform_2(%arg0: i32) -> (i32, i32) {
    %c0_i32 = arith.constant 0 : i32
    %c0_i32_0 = arith.constant 0 : i32
    %c0_i32_1 = arith.constant 0 : i32
    return %c0_i32, %c0_i32_0 : i32, i32
  }
  func.func @transform_3(%arg0: i32) -> (i32, i32) {
    %c0_i32 = arith.constant 0 : i32
    %c0_i32_0 = arith.constant 0 : i32
    %c0_i32_1 = arith.constant 0 : i32
    return %c0_i32, %c0_i32_0 : i32, i32
  }
  func.func @transform_4(%arg0: i32) -> (i32, i32) {
    %c0_i32 = arith.constant 0 : i32
    %c0_i32_0 = arith.constant 0 : i32
    %c0_i32_1 = arith.constant 0 : i32
    return %c0_i32, %c0_i32_0 : i32, i32
  }
  func.func @transform_5(%arg0: i32) -> (i32, i32) {
    %c0_i32 = arith.constant 0 : i32
    %c0_i32_0 = arith.constant 0 : i32
    return %arg0, %c0_i32 : i32, i32
  }
}

</mosaic_0001>

<bundles_post_ra>
// kernel: tpu_custom_call.1
= control target key start
LH: loop header
LB: loop body
LE: loop exit
PB: predicated region body
PF: predicated region fallthrough
CT: control target
= control target key end

     0   :  { %10 = vsyncpa [#allocation3], 0  ;;  %s611_s0 = inlined_call_operand.hbm [shape: f32[8,2048], index: 0, kind: input, shape index: {}]   ;;  %s612_s1 = inlined_call_operand.hbm [shape: bf16[128,128], index: 1, kind: input, shape index: {}]   ;;  %s613_s2 = inlined_call_operand.vmem [shape: f32[1,128], index: 2, kind: input, shape index: {}]   ;;  %s614_s3 = inlined_call_operand.hbm [shape: bf16[128,128], index: 3, kind: input, shape index: {}]   ;;  %s615_s4 = inlined_call_operand.vmem [shape: f32[1,128], index: 4, kind: input, shape index: {}]   ;;  %s616_s5 = inlined_call_operand.hbm [shape: f32[8,128], index: 5, kind: output, shape index: {}]  }
   0x1   :  { %11 = vsyncpa [#allocation6], 0 }
   0x2   :  { %12 = vsyncpa [#allocation4], 0  ;;  %s510_s18 = smov [#allocation5]   ;;  %s416_s22 = scalar_lea.hbm %s612_s1, 1024 }
   0x3   :  { %s28_s19 = sshll.u32 %s510_s18, 4  ;;  %p417_p0 = scmp.ne.s32.totalorder %s612_s1, %s416_s22  ;;  %s29_s19 = int_to_ptr.vmem [resolvable:$true] %s28_s19 }
   0x4   :  { %p420_p1 = scmp.lt.u32.totalorder %s416_s22, %s612_s1 }
   0x6   :  { %p422_p2 = pnand %p420_p1, %p417_p0 }
   0x8   :  { %425 = shalt.err (!%p422_p2)
}
   0x9   :  { %s426_s27 = scalar_lea.vmem %s29_s19, 1024  ;;  %p431_p4 = scmp.lt.s32.totalorder %s29_s19, %s29_s19 }
   0xa   :  { %p427_p3 = scmp.ne.s32.totalorder %s29_s19, %s426_s27  ;;  %p432_p5 = scmp.lt.s32.totalorder %s426_s27, %s426_s27 }
   0xc   :  { %p433_p6 = por %p432_p5, %p431_p4 }
   0xe   :  { %p434_p7 = pnand %p433_p6, %p427_p3 }
  0x10   :  { %437 = shalt.err (!%p434_p7)
}
  0x11   :  { %s511_s28 = smov 64   ;;  %s512_s29 = smov 4  }
  0x12   :  { %34 = dma.hbm_to_vmem [thread:$0]  %s612_s1, 1024, %s29_s19, [#allocation6], %s511_s28, %s511_s28, %s512_s29  }
  0x13   :  { %s513_s7 = smov [#allocation2]   ;;  %s514_s9 = smov [#allocation7]  }
  0x14   :  { %s19_s8 = sshll.u32 %s513_s7, 4  ;;  %s42_s10 = sshll.u32 %s514_s9, 4  ;;  %s20_s8 = int_to_ptr.vmem [resolvable:$true] %s19_s8  ;;  %s43_s10 = int_to_ptr.vmem [resolvable:$true] %s42_s10 }
  0x15   :  { %s438_s13 = scalar_lea.hbm %s611_s0, 128  ;;  %s440_s18 = scalar_lea.hbm %s611_s0, 2048 }
  0x16   :  { %p439_p8 = scmp.ne.s32.totalorder %s611_s0, %s438_s13  ;;  %p441_p9 = scmp.lt.u32.totalorder %s440_s18, %s438_s13 }
  0x17   :  { %p442_p10 = scmp.lt.u32.totalorder %s438_s13, %s611_s0 }
  0x19   :  { %p443_p11 = por %p442_p10, %p441_p9 }
  0x1b   :  { %p444_p12 = pnand %p443_p11, %p439_p8 }
  0x1d   :  { %447 = shalt.err (!%p444_p12)
}
  0x1e   :  { %s448_s19 = scalar_lea.vmem %s20_s8, 128  ;;  %p453_p0 = scmp.lt.s32.totalorder %s20_s8, %s20_s8 }
  0x1f   :  { %p449_p13 = scmp.ne.s32.totalorder %s20_s8, %s448_s19  ;;  %p454_p1 = scmp.lt.s32.totalorder %s448_s19, %s448_s19 }
  0x21   :  { %p455_p2 = por %p454_p1, %p453_p0 }
  0x23   :  { %p456_p3 = pnand %p455_p2, %p449_p13 }
  0x25   :  { %459 = shalt.err (!%p456_p3)
}
  0x26   :  { %22 = dma.hbm_to_vmem [thread:$0]  %s611_s0, 128, %s20_s8, [#allocation3]  }
  0x27   :  { %s460_s25 = scalar_lea.hbm %s614_s3, 1024 }
  0x28   :  { %p461_p4 = scmp.ne.s32.totalorder %s614_s3, %s460_s25  ;;  %p464_p5 = scmp.lt.u32.totalorder %s460_s25, %s614_s3 }
  0x2a   :  { %p466_p6 = pnand %p464_p5, %p461_p4 }
  0x2c   :  { %469 = shalt.err (!%p466_p6)
}
  0x2d   :  { %s470_s7 = scalar_lea.vmem %s43_s10, 1024  ;;  %p475_p8 = scmp.lt.s32.totalorder %s43_s10, %s43_s10 }
  0x2e   :  { %p471_p7 = scmp.ne.s32.totalorder %s43_s10, %s470_s7  ;;  %p476_p9 = scmp.lt.s32.totalorder %s470_s7, %s470_s7 }
  0x30   :  { %p477_p10 = por %p476_p9, %p475_p8 }
  0x32   :  { %p478_p11 = pnand %p477_p10, %p471_p7 }
  0x34   :  { %481 = shalt.err (!%p478_p11)
}
  0x35   :  { %48 = dma.hbm_to_vmem [thread:$0]  %s614_s3, 1024, %s43_s10, [#allocation6], %s511_s28, %s511_s28, %s512_s29  }
  0x36   :  { %504 = dma.done.wait [#allocation3], 128  }
  0x37   :  { %505 = vsyncadd [#allocation3], 4294967168 }
  0x38   :  { %506 = dma.done.wait [#allocation6], 2048  }
  0x39   :  { %507 = vsyncadd [#allocation6], 4294965248  ;;  %v515_v0 = vmov 0.0   ;;  %vm516_vm0 = vmmov 0   ;;  %v396_v1 = vld [vmem:[#allocation5] sm:$0xff]   ;;  %v397_v2 = vld [vmem:[#allocation5 + $0x8] sm:$0xff]  }
  0x3a   :  { %348 = vmatprep.subr.bf16.mxu0 %v515_v0  ;;  %364 = vmatprep.mubr.msk.bf16.mxu0 %vm516_vm0, %v515_v0  ;;  %v398_v3 = vld [vmem:[#allocation5 + $0x10] sm:$0xff]   ;;  %v399_v4 = vld [vmem:[#allocation5 + $0x18] sm:$0xff]   ;;  %v400_v5 = vld [vmem:[#allocation5 + $0x20] sm:$0xff]   ;;  %s517_s9 = smov [#allocation8]  }
  0x3b   :  { %368 = vmatprep.subr.bf16.mxu1 %v515_v0  ;;  %384 = vmatprep.mubr.msk.bf16.mxu1 %vm516_vm0, %v515_v0  ;;  %v401_v6 = vld [vmem:[#allocation5 + $0x28] sm:$0xff]   ;;  %v402_v7 = vld [vmem:[#allocation5 + $0x30] sm:$0xff]   ;;  %v403_v8 = vld [vmem:[#allocation5 + $0x38] sm:$0xff]   ;;  %s302_s10 = sshll.u32 %s517_s9, 4  ;;  %s303_s10 = int_to_ptr.vmem [resolvable:$true] %s302_s10 }
  0x3c   :  { %349 = vmatpush3.bf16.msra.mxu0 %v396_v1  ;;  %v61_v9 = vld [vmem:[#allocation2] sm:$0xff]  ;;  %v404_v11 = vld [vmem:[#allocation7] sm:$0xff]   ;;  %v405_v12 = vld [vmem:[#allocation7 + $0x8] sm:$0xff]   ;;  %s482_s11 = scalar_lea.vmem %s303_s10, 128  ;;  %p487_p13 = scmp.lt.s32.totalorder %s303_s10, %s303_s10 }
  0x3d   :  { %350 = vmatprep.subr.bf16.mxu0 %v515_v0  ;;  %v62_v10 = vpack.c.bf16 %v61_v9, %v61_v9  ;;  %369 = vmatpush3.bf16.msra.mxu1 %v404_v11  ;;  %v406_v13 = vld [vmem:[#allocation7 + $0x10] sm:$0xff]   ;;  %v407_v14 = vld [vmem:[#allocation7 + $0x18] sm:$0xff]   ;;  %v408_v15 = vld [vmem:[#allocation7 + $0x20] sm:$0xff]   ;;  %p483_p12 = scmp.ne.s32.totalorder %s303_s10, %s482_s11  ;;  %p488_p0 = scmp.lt.s32.totalorder %s482_s11, %s482_s11 }
  0x3e   :  { %370 = vmatprep.subr.bf16.mxu1 %v515_v0  ;;  %v409_v16 = vld [vmem:[#allocation7 + $0x28] sm:$0xff]   ;;  %v410_v17 = vld [vmem:[#allocation7 + $0x30] sm:$0xff]   ;;  %v411_v18 = vld [vmem:[#allocation7 + $0x38] sm:$0xff]  }
  0x3f   :  { %v312_v19 = vld [vmem:[%s613_s2] ss:$0 sm:$0xff]  ;;  %p489_p1 = por %p488_p0, %p487_p13 }
  0x40   :  { %351 = vmatpush3.bf16.msra.mxu0 %v397_v2  ;;  %v321_v35 = vld [vmem:[%s615_s4] ss:$0 sm:$0xff] }
  0x41   :  { %352 = vmatprep.subr.bf16.mxu0 %v515_v0  ;;  %371 = vmatpush3.bf16.msra.mxu1 %v405_v12  ;;  %p490_p2 = pnand %p489_p1, %p483_p12 }
  0x42   :  { %372 = vmatprep.subr.bf16.mxu1 %v515_v0 }
  0x44   :  { %353 = vmatpush3.bf16.msra.mxu0 %v398_v3 }
  0x45   :  { %354 = vmatprep.subr.bf16.mxu0 %v515_v0  ;;  %373 = vmatpush3.bf16.msra.mxu1 %v406_v13 }
  0x46   :  { %374 = vmatprep.subr.bf16.mxu1 %v515_v0 }
  0x48   :  { %355 = vmatpush3.bf16.msra.mxu0 %v399_v4 }
  0x49   :  { %356 = vmatprep.subr.bf16.mxu0 %v515_v0  ;;  %375 = vmatpush3.bf16.msra.mxu1 %v407_v14 }
  0x4a   :  { %376 = vmatprep.subr.bf16.mxu1 %v515_v0 }
  0x4c   :  { %357 = vmatpush3.bf16.msra.mxu0 %v400_v5 }
  0x4d   :  { %358 = vmatprep.subr.bf16.mxu0 %v515_v0  ;;  %377 = vmatpush3.bf16.msra.mxu1 %v408_v15 }
  0x4e   :  { %378 = vmatprep.subr.bf16.mxu1 %v515_v0 }
  0x50   :  { %359 = vmatpush3.bf16.msra.mxu0 %v401_v6 }
  0x51   :  { %360 = vmatprep.subr.bf16.mxu0 %v515_v0  ;;  %379 = vmatpush3.bf16.msra.mxu1 %v409_v16 }
  0x52   :  { %380 = vmatprep.subr.bf16.mxu1 %v515_v0 }
  0x54   :  { %361 = vmatpush3.bf16.msra.mxu0 %v402_v7 }
  0x55   :  { %362 = vmatprep.subr.bf16.mxu0 %v515_v0  ;;  %381 = vmatpush3.bf16.msra.mxu1 %v410_v17 }
  0x56   :  { %382 = vmatprep.subr.bf16.mxu1 %v515_v0 }
  0x58   :  { %363 = vmatpush3.bf16.msra.mxu0 %v403_v8 }
  0x59   :  { %383 = vmatpush3.bf16.msra.mxu1 %v411_v18 }
  0x5b   :  { %365 = vmatmul.mubr.bf16.vlgmr.msra.gmra.mrb[0].mxu0 %v62_v10 }
 0x12e   :  { %v168_v20 = vpop.f32.mrb[0].mxu0 }
 0x12f   :  { %v169_v21 = vadd.f32 %v312_v19, %v168_v20  ;;  %v366_v22 = vpop.f32.mrb[1].mxu0 }
 0x130   :  { %v171_v23 = vpop.f32.mrb[2].mxu0 }
 0x131   :  { %v174_v24 = vmin.f32 %v169_v21, 20.0  ;;  %v367_v25 = vpop.f32.mrb[3].mxu0 }
 0x133   :  { %v175_v26 = vmul.f32 1.442695, %v174_v24 }
 0x135   :  { %412 = vpow2.f32 %v175_v26 }
 0x13f   :  { %v413_v27 = vpop.eup %412 }
 0x140   :  { %v177_v28 = vadd.f32 2.0, %v413_v27 }
 0x142   :  { %v178_v29 = vmul.f32 %v413_v27, %v177_v28 }
 0x144   :  { %v179_v30 = vadd.f32 2.0, %v178_v29 }
 0x146   :  { %414 = vrcp.f32 %v179_v30 }
 0x150   :  { %v415_v31 = vpop.eup %414 }
 0x151   :  { %v181_v32 = vmul.f32 %v415_v31, %v178_v29 }
 0x153   :  { %v182_v33 = vmul.f32 %v181_v32, %v169_v21 }
 0x155   :  { %v183_v34 = vpack.c.bf16 %v182_v33, %v182_v33 }
 0x157   :  { %385 = vmatmul.mubr.bf16.vlgmr.msra.gmra.mrb[0].mxu1 %v183_v34 }
 0x22a   :  { %v289_v36 = vpop.f32.mrb[0].mxu1 }
 0x22b   :  { %v290_v37 = vadd.f32 %v321_v35, %v289_v36  ;;  %v386_v38 = vpop.f32.mrb[1].mxu1 }
 0x22c   :  { %v292_v39 = vpop.f32.mrb[2].mxu1 }
 0x22d   :  { %295 = vst [vmem:[#allocation8] sm:$0xff] %v290_v37  ;;  %v387_v40 = vpop.f32.mrb[3].mxu1 }
 0x22e   :  { %493 = shalt.err (!%p490_p2)
}
 0x22f   :  { %s494_s4 = scalar_lea.hbm %s616_s5, 128 }
 0x230   :  { %p495_p3 = scmp.ne.s32.totalorder %s616_s5, %s494_s4  ;;  %p498_p4 = scmp.lt.u32.totalorder %s494_s4, %s616_s5 }
 0x232   :  { %p500_p5 = pnand %p498_p4, %p495_p3 }
 0x234   :  { %503 = shalt.err (!%p500_p5)
}
 0x235   :  { %305 = dma.vmem_to_hbm [thread:$0]  %s303_s10, 128, %s616_s5, [#allocation4]  }
 0x236   :  { %508 = dma.done.wait [#allocation4], 128  }
 0x237   :  { %509 = vsyncadd [#allocation4], 4294967168 }
 0x238   :  { %309 = vsyncpa [#allocation3], 1 }
 0x239   :  { %310 = vsyncpa [#allocation6], 1 }
 0x23a   :  { %311 = vsyncpa [#allocation4], 1 }

</bundles_post_ra>
